<compile_context>
chip_gen: v7x
topology: tpu7x:2x2x1
jax: 0.10.0
libtpu: 0.0.40
codegen_flags: <defaults>
</compile_context>

<pallas_src>
import functools

import jax
import jax.numpy as jnp
from jax.experimental import pallas as pl
from jax.experimental.pallas import tpu as pltpu


def _round_up(x, m):
    return ((x + m - 1) // m) * m


# ---------------------------------------------------------------------------
# Helpers mirroring the PyTorch-side utilities
# ---------------------------------------------------------------------------
def get_mixer_mask(n, dtype=jnp.complex64, band_width=-1):
    """Mask limiting which Fourier modes may mix.  band_width < 0 => no limit."""
    if band_width is None or band_width < 0:
        return jnp.ones((n, n), dtype=dtype)
    # TODO(synk): original get_mixer_mask source unavailable; best-effort band
    # mask (|i-j| <= band_width in the gathered low|high index space).
    i = jnp.arange(n)[:, None]
    j = jnp.arange(n)[None, :]
    return (jnp.abs(i - j) <= band_width).astype(dtype)


def get_pweights(m, n):
    """spectral_decay buffer (only used by get_reg_loss, not the forward)."""
    k = jnp.minimum(jnp.arange(m)[:, None], jnp.arange(n)[None, :]).astype(jnp.float32)
    return (1.0 + k).astype(jnp.complex64)


# ---------------------------------------------------------------------------
# Pallas kernel
#   X      : (Cb, 2*Bh, Kp)   rows [0:Bh) = real(x) bands, rows [Bh:2Bh) = imag
#   W_cat  : (Cb, Kp, 2*Np)   [Wr^T | Wi^T], zero padded, compute_dtype
#   bias   : (Cb, 8, Np)      row 0 = real bias, row 1 = imag bias (f32)
#   out    : (Cb, 2*Bh, Np)   rows [0:Bh) = real result, [Bh:2Bh) = imag (f32)
#
#   y = X @ W_cat :  y[:Bh,:Np]=xr@Wr^T  y[:Bh,Np:]=xr@Wi^T
#                    y[Bh:,:Np]=xi@Wr^T  y[Bh:,Np:]=xi@Wi^T
#   out_r = xr@Wr^T - xi@Wi^T + br ;  out_i = xr@Wi^T + xi@Wr^T + bi
# ---------------------------------------------------------------------------
def _mixer_kernel(x_ref, w_ref, b_ref, o_ref, *, Bh, Np, Cb):
    for c in range(Cb):  # static unroll: guaranteed clean 2-D MXU matmuls
        y = jnp.dot(x_ref[c], w_ref[c], preferred_element_type=jnp.float32)
        br = b_ref[c, 0:1, :]
        bi = b_ref[c, 1:2, :]
        o_ref[c, :Bh, :] = y[:Bh, :Np] - y[Bh:, Np:] + br
        o_ref[c, Bh:, :] = y[:Bh, Np:] + y[Bh:, :Np] + bi


def _physical_vmem_bytes():
    try:
        return int(pltpu.get_tpu_info().vmem_capacity_bytes)
    except Exception:
        return 64 * 1024 * 1024  # conservative (v7x per-TC)


def _pick_channel_block(C, rows, Kp, Np, x_itemsize, w_itemsize, budget_bytes,
                        max_cb=32):
    """Largest channel block whose double-buffered slabs fit the budget,
    preferring an EVEN grid-step count (v7x megacore split), then >= 2 steps."""
    def per_step_bytes(cb):
        x_b = cb * rows * Kp * x_itemsize
        w_b = cb * Kp * (2 * Np) * w_itemsize
        b_b = cb * 8 * Np * 4
        o_b = cb * rows * Np * 4
        return x_b + w_b + b_b + o_b

    divisors = [d for d in range(1, C + 1) if C % d == 0 and d <= max_cb]
    fitting = [d for d in divisors if 2 * per_step_bytes(d) <= budget_bytes] or [1]
    even_steps = [d for d in fitting if (C // d) % 2 == 0]
    multi = [d for d in fitting if C // d >= 2]
    if even_steps:
        cb = max(even_steps)
    elif multi:
        cb = max(multi)
    else:
        cb = max(fitting)
    return cb, per_step_bytes(cb)


def _pallas_channel_matmul(X, wcat, bstack, *, Bh, Np):
    """X:(C,2Bh,Kp); wcat:(C,Kp,2Np); bstack:(C,8,Np) -> out:(C,2Bh,Np) f32."""
    C, rows, Kp = X.shape
    x_item = jnp.dtype(X.dtype).itemsize
    w_item = jnp.dtype(wcat.dtype).itemsize

    phys = _physical_vmem_bytes()
    budget = int(0.6 * phys)  # total allowance for double-buffered slabs
    Cb, per_step = _pick_channel_block(C, rows, Kp, Np, x_item, w_item, budget)

    vmem_limit = int(min(phys - (8 << 20), max(32 << 20, 2 * per_step + (8 << 20))))
    if 2 * per_step > vmem_limit:
        # TODO(synk): output-column tiling (second grid axis) for very large M.
        raise ValueError(
            "SpectralMixer_1D Pallas kernel: per-channel working set "
            f"({2 * per_step} B double-buffered) exceeds the VMEM limit "
            f"({vmem_limit} B); output-column tiling not implemented yet.")

    kernel = functools.partial(_mixer_kernel, Bh=Bh, Np=Np, Cb=Cb)
    return pl.pallas_call(
        kernel,
        grid=(C // Cb,),
        in_specs=[
            pl.BlockSpec((Cb, rows, Kp), lambda c: (c, 0, 0)),
            pl.BlockSpec((Cb, Kp, 2 * Np), lambda c: (c, 0, 0)),
            pl.BlockSpec((Cb, 8, Np), lambda c: (c, 0, 0)),
        ],
        out_specs=pl.BlockSpec((Cb, rows, Np), lambda c: (c, 0, 0)),
        out_shape=jax.ShapeDtypeStruct((C, rows, Np), jnp.float32),
        compiler_params=pltpu.CompilerParams(
            dimension_semantics=("parallel",),
            vmem_limit_bytes=vmem_limit,
        ),
    )(X, wcat, bstack)


# ---------------------------------------------------------------------------
# One-time parameter preparation (hoisted out of the per-call forward)
# ---------------------------------------------------------------------------
def prepare_spectral_mixer_1d(W1, bias1, in_modes1, mixer_band=-1,
                              compute_dtype=jnp.bfloat16):
    """Band-gather, mask, transpose, split, concat, pad and cast params once.

    Returns (wcat, bstack, h, s):
      wcat   : (C, Kp, 2*Np) compute_dtype  — [Wr^T | Wi^T], zero padded.
      bstack : (C, 8, Np) f32               — row 0 real bias, row 1 imag bias.
    """
    C, mode_size, _ = W1.shape
    h = min(mode_size // 2, in_modes1 // 2)
    s = in_modes1 % 2
    M = 2 * h + s

    eW = jnp.zeros((C, M, M), dtype=W1.dtype)
    eW = eW.at[:, : h + s, : h + s].set(W1[:, : h + s, : h + s])
    eW = eW.at[:, M - h :, : h + s].set(W1[:, mode_size - h :, : h + s])
    eW = eW.at[:, : h + s, M - h :].set(W1[:, : h + s, mode_size - h :])
    eW = eW.at[:, M - h :, M - h :].set(W1[:, mode_size - h :, mode_size - h :])

    eb = jnp.zeros((C, M), dtype=W1.dtype)
    eb = eb.at[:, : h + s].set(bias1[:, : h + s])
    eb = eb.at[:, M - h :].set(bias1[:, mode_size - h :])

    mask = get_mixer_mask(M, dtype=W1.dtype, band_width=mixer_band)
    eWm = eW * mask[None, :, :]

    cdt = jnp.dtype(compute_dtype)
    sub_k = 16 if cdt == jnp.dtype(jnp.bfloat16) else 8
    Kp = _round_up(M, sub_k)       # contraction dim: sublane granule only
    Np = _round_up(M, 128)         # output dim: lane-dense

    wT = jnp.swapaxes(eWm, 1, 2)   # out = x_bands @ W^T
    wr = jnp.real(wT).astype(jnp.float32)
    wi = jnp.imag(wT).astype(jnp.float32)

    def pad_w(t):
        return jnp.pad(t, ((0, 0), (0, Kp - M), (0, Np - M)))

    wcat = jnp.concatenate([pad_w(wr), pad_w(wi)], axis=-1).astype(cdt)

    bstack = jnp.zeros((C, 8, Np), jnp.float32)
    bstack = bstack.at[:, 0, :M].set(jnp.real(eb).astype(jnp.float32))
    bstack = bstack.at[:, 1, :M].set(jnp.imag(eb).astype(jnp.float32))
    return wcat, bstack, h, s


# ---------------------------------------------------------------------------
# Forward pass (band gather/scatter in JAX, hot matmul path in Pallas)
# ---------------------------------------------------------------------------
@functools.partial(jax.jit, static_argnames=("h", "s"))
def spectral_mixer_1d_forward(x, wcat, bstack, *, h, s):
    """x: (B, C, N) complex64; wcat/bstack from prepare_spectral_mixer_1d."""
    B, C, N = x.shape
    M = 2 * h + s
    Kp = wcat.shape[1]
    Np = wcat.shape[2] // 2
    cdt = wcat.dtype

    Bh = _round_up(B, 8)           # f32 output slices only need 8-row alignment
    xr = jnp.real(x)
    xi = jnp.imag(x)

    def bands(t):                  # (B,C,N) -> (B,C,M) low|high frequency bands
        return jnp.concatenate([t[..., : h + s], t[..., N - h :]], axis=-1)

    gr = jnp.transpose(bands(xr), (1, 0, 2)).astype(cdt)   # (C, B, M)
    gi = jnp.transpose(bands(xi), (1, 0, 2)).astype(cdt)

    def pad_x(t):
        return jnp.pad(t, ((0, 0), (0, Bh - B), (0, Kp - M)))

    X = jnp.concatenate([pad_x(gr), pad_x(gi)], axis=1)    # (C, 2*Bh, Kp)

    out = _pallas_channel_matmul(X, wcat, bstack, Bh=Bh, Np=Np)  # (C,2Bh,Np) f32

    mixed = jax.lax.complex(out[:, :B, :M], out[:, Bh : Bh + B, :M]).astype(x.dtype)
    mixed = jnp.transpose(mixed, (1, 0, 2))                 # (B, C, M)

    # Single concatenate along the mode axis == the two in-place band writes.
    mid = x[:, :, h + s : N - h]
    return jnp.concatenate([mixed[:, :, : h + s], mid, mixed[:, :, M - h :]],
                           axis=-1)


# ---------------------------------------------------------------------------
# Deterministic parameter init (reset_parameter: normal, std=(2/mode_size)**0.5)
# ---------------------------------------------------------------------------
def init_params(key, num_channels, mode_size):
    scale = (2.0 / mode_size) ** 0.5
    k1, k2, k3, k4 = jax.random.split(key, 4)
    W1 = (
        jax.random.normal(k1, (num_channels, mode_size, mode_size), jnp.float32)
        + 1j * jax.random.normal(k2, (num_channels, mode_size, mode_size), jnp.float32)
    ).astype(jnp.complex64) * (scale / jnp.sqrt(2.0))
    bias1 = (
        jax.random.normal(k3, (num_channels, mode_size), jnp.float32)
        + 1j * jax.random.normal(k4, (num_channels, mode_size), jnp.float32)
    ).astype(jnp.complex64) * (scale / jnp.sqrt(2.0))
    return W1, bias1


if __name__ == "__main__":
    key = jax.random.PRNGKey(0)
    B, C, N = 2, 4, 16          # batch, num_channels, #Fourier coefficients
    mode_size = 16
    mixer_band = -1

    kx, kp = jax.random.split(key)
    kxr, kxi = jax.random.split(kx)
    x = (
        jax.random.normal(kxr, (B, C, N), jnp.float32)
        + 1j * jax.random.normal(kxi, (B, C, N), jnp.float32)
    ).astype(jnp.complex64)

    W1, bias1 = init_params(kp, C, mode_size)

    # --- Pure-JAX reference for the same forward semantics ---
    h = min(mode_size // 2, N // 2)
    s = N % 2
    M = 2 * h + s
    temp = jnp.zeros((B, C, M), dtype=x.dtype)
    temp = temp.at[:, :, : h + s].set(x[:, :, : h + s])
    temp = temp.at[:, :, M - h :].set(x[:, :, N - h :])
    eW = jnp.zeros((C, M, M), dtype=x.dtype)
    eW = eW.at[:, : h + s, : h + s].set(W1[:, : h + s, : h + s])
    eW = eW.at[:, M - h :, : h + s].set(W1[:, mode_size - h :, : h + s])
    eW = eW.at[:, : h + s, M - h :].set(W1[:, : h + s, mode_size - h :])
    eW = eW.at[:, M - h :, M - h :].set(W1[:, mode_size - h :, mode_size - h :])
    eb = jnp.zeros((C, M), dtype=x.dtype)
    eb = eb.at[:, : h + s].set(bias1[:, : h + s])
    eb = eb.at[:, M - h :].set(bias1[:, mode_size - h :])
    mask = get_mixer_mask(M, dtype=x.dtype, band_width=mixer_band)
    ref_mixed = jnp.einsum("cij,bcj->bci", eW * mask[None], temp) + eb[None]
    ref = x
    ref = ref.at[:, :, : h + s].set(ref_mixed[:, :, : h + s])
    ref = ref.at[:, :, N - h :].set(ref_mixed[:, :, M - h :])

    # --- f32 compute path (bit-faithful to the cfloat PyTorch module) ---
    wcat32, b32, h_, s_ = prepare_spectral_mixer_1d(
        W1, bias1, in_modes1=N, mixer_band=mixer_band, compute_dtype=jnp.float32)
    out32 = spectral_mixer_1d_forward(x, wcat32, b32, h=h_, s=s_)
    out32 = jax.block_until_ready(out32)
    assert jnp.allclose(out32, ref, atol=1e-4, rtol=1e-4), "f32 mismatch vs reference"

    # --- bf16 compute path (default: halves the dominant weight HBM stream) ---
    wcat16, b16, h_, s_ = prepare_spectral_mixer_1d(
        W1, bias1, in_modes1=N, mixer_band=mixer_band)   # compute_dtype=bf16
    out16 = spectral_mixer_1d_forward(x, wcat16, b16, h=h_, s=s_)
    out16 = jax.block_until_ready(out16)
    assert jnp.allclose(out16, ref, atol=5e-2, rtol=5e-2), "bf16 mismatch vs reference"

    print("KERNEL_OK")
</pallas_src>

<mosaic_0001>
module attributes {stable_mosaic.version = 11 : i64} {
  func.func @_mixer_kernel(%arg0: i32, %arg1: memref<2x16x16xf32, #tpu.memory_space<vmem>>, %arg2: memref<2x16x256xf32, #tpu.memory_space<vmem>>, %arg3: memref<2x8x128xf32, #tpu.memory_space<vmem>>, %arg4: memref<2x16x128xf32, #tpu.memory_space<vmem>>) attributes {dimension_semantics = [#tpu.dimension_semantics<parallel>], iteration_bounds = array<i64: 2>, scalar_prefetch = 0 : i64, scratch_operands = 0 : i64, tpu.core_type = #tpu.core_type<tc>, window_params = [{transform_indices = @transform_0, window_bounds = array<i64: 2, 16, 16>}, {transform_indices = @transform_1, window_bounds = array<i64: 2, 16, 256>}, {transform_indices = @transform_2, window_bounds = array<i64: 2, 8, 128>}, {transform_indices = @transform_3, window_bounds = array<i64: 2, 16, 128>}]} {
    %c0 = arith.constant 0 : index
    %c0_0 = arith.constant 0 : index
    %c0_1 = arith.constant 0 : index
    %0 = vector.load %arg1[%c0, %c0_0, %c0_1] : memref<2x16x16xf32, #tpu.memory_space<vmem>>, vector<1x16x16xf32>
    %1 = vector.shape_cast %0 : vector<1x16x16xf32> to vector<16x16xf32>
    %c0_2 = arith.constant 0 : index
    %c0_3 = arith.constant 0 : index
    %c0_4 = arith.constant 0 : index
    %2 = vector.load %arg2[%c0_2, %c0_3, %c0_4] : memref<2x16x256xf32, #tpu.memory_space<vmem>>, vector<1x16x256xf32>
    %3 = vector.shape_cast %2 : vector<1x16x256xf32> to vector<16x256xf32>
    %cst = arith.constant dense<0.000000e+00> : vector<16x256xf32>
    %4 = tpu.matmul %1, %3, %cst {dimension_numbers = #tpu.dot_dimension_numbers<[1], [0], [0], [1], [0, 0, 1, 1], [], []>} : vector<16x16xf32>, vector<16x256xf32>, vector<16x256xf32> -> vector<16x256xf32>
    %c0_5 = arith.constant 0 : index
    %c0_6 = arith.constant 0 : index
    %c0_7 = arith.constant 0 : index
    %5 = vector.load %arg3[%c0_5, %c0_6, %c0_7] : memref<2x8x128xf32, #tpu.memory_space<vmem>>, vector<1x1x128xf32>
    %6 = vector.shape_cast %5 : vector<1x1x128xf32> to vector<1x128xf32>
    %c0_8 = arith.constant 0 : index
    %c1 = arith.constant 1 : index
    %c0_9 = arith.constant 0 : index
    %7 = vector.load %arg3[%c0_8, %c1, %c0_9] : memref<2x8x128xf32, #tpu.memory_space<vmem>>, vector<1x1x128xf32>
    %8 = vector.shape_cast %7 : vector<1x1x128xf32> to vector<1x128xf32>
    %9 = vector.extract_strided_slice %4 {offsets = [0, 0], sizes = [8, 128], strides = [1, 1]} : vector<16x256xf32> to vector<8x128xf32>
    %10 = vector.extract_strided_slice %4 {offsets = [8, 128], sizes = [8, 128], strides = [1, 1]} : vector<16x256xf32> to vector<8x128xf32>
    %11 = arith.subf %9, %10 : vector<8x128xf32>
    %12 = vector.broadcast %6 : vector<1x128xf32> to vector<8x128xf32>
    %13 = arith.addf %11, %12 : vector<8x128xf32>
    %c0_10 = arith.constant 0 : index
    %c0_11 = arith.constant 0 : index
    %c0_12 = arith.constant 0 : index
    %14 = vector.load %arg4[%c0_10, %c0_11, %c0_12] : memref<2x16x128xf32, #tpu.memory_space<vmem>>, vector<1x8x128xf32>
    %15 = vector.shape_cast %14 : vector<1x8x128xf32> to vector<8x128xf32>
    %16 = vector.shape_cast %13 : vector<8x128xf32> to vector<1x8x128xf32>
    tpu.vector_store %arg4[%c0_10, %c0_11, %c0_12], %16 {strides = array<i32>} : memref<2x16x128xf32, #tpu.memory_space<vmem>>, vector<1x8x128xf32>,
    %17 = vector.extract_strided_slice %4 {offsets = [0, 128], sizes = [8, 128], strides = [1, 1]} : vector<16x256xf32> to vector<8x128xf32>
    %18 = vector.extract_strided_slice %4 {offsets = [8, 0], sizes = [8, 128], strides = [1, 1]} : vector<16x256xf32> to vector<8x128xf32>
    %19 = arith.addf %17, %18 : vector<8x128xf32>
    %20 = vector.broadcast %8 : vector<1x128xf32> to vector<8x128xf32>
    %21 = arith.addf %19, %20 : vector<8x128xf32>
    %c0_13 = arith.constant 0 : index
    %c8 = arith.constant 8 : index
    %c0_14 = arith.constant 0 : index
    %22 = vector.load %arg4[%c0_13, %c8, %c0_14] : memref<2x16x128xf32, #tpu.memory_space<vmem>>, vector<1x8x128xf32>
    %23 = vector.shape_cast %22 : vector<1x8x128xf32> to vector<8x128xf32>
    %24 = vector.shape_cast %21 : vector<8x128xf32> to vector<1x8x128xf32>
    tpu.vector_store %arg4[%c0_13, %c8, %c0_14], %24 {strides = array<i32>} : memref<2x16x128xf32, #tpu.memory_space<vmem>>, vector<1x8x128xf32>,
    %c1_15 = arith.constant 1 : index
    %c0_16 = arith.constant 0 : index
    %c0_17 = arith.constant 0 : index
    %25 = vector.load %arg1[%c1_15, %c0_16, %c0_17] : memref<2x16x16xf32, #tpu.memory_space<vmem>>, vector<1x16x16xf32>
    %26 = vector.shape_cast %25 : vector<1x16x16xf32> to vector<16x16xf32>
    %c1_18 = arith.constant 1 : index
    %c0_19 = arith.constant 0 : index
    %c0_20 = arith.constant 0 : index
    %27 = vector.load %arg2[%c1_18, %c0_19, %c0_20] : memref<2x16x256xf32, #tpu.memory_space<vmem>>, vector<1x16x256xf32>
    %28 = vector.shape_cast %27 : vector<1x16x256xf32> to vector<16x256xf32>
    %cst_21 = arith.constant dense<0.000000e+00> : vector<16x256xf32>
    %29 = tpu.matmul %26, %28, %cst_21 {dimension_numbers = #tpu.dot_dimension_numbers<[1], [0], [0], [1], [0, 0, 1, 1], [], []>} : vector<16x16xf32>, vector<16x256xf32>, vector<16x256xf32> -> vector<16x256xf32>
    %c1_22 = arith.constant 1 : index
    %c0_23 = arith.constant 0 : index
    %c0_24 = arith.constant 0 : index
    %30 = vector.load %arg3[%c1_22, %c0_23, %c0_24] : memref<2x8x128xf32, #tpu.memory_space<vmem>>, vector<1x1x128xf32>
    %31 = vector.shape_cast %30 : vector<1x1x128xf32> to vector<1x128xf32>
    %c1_25 = arith.constant 1 : index
    %c1_26 = arith.constant 1 : index
    %c0_27 = arith.constant 0 : index
    %32 = vector.load %arg3[%c1_25, %c1_26, %c0_27] : memref<2x8x128xf32, #tpu.memory_space<vmem>>, vector<1x1x128xf32>
    %33 = vector.shape_cast %32 : vector<1x1x128xf32> to vector<1x128xf32>
    %34 = vector.extract_strided_slice %29 {offsets = [0, 0], sizes = [8, 128], strides = [1, 1]} : vector<16x256xf32> to vector<8x128xf32>
    %35 = vector.extract_strided_slice %29 {offsets = [8, 128], sizes = [8, 128], strides = [1, 1]} : vector<16x256xf32> to vector<8x128xf32>
    %36 = arith.subf %34, %35 : vector<8x128xf32>
    %37 = vector.broadcast %31 : vector<1x128xf32> to vector<8x128xf32>
    %38 = arith.addf %36, %37 : vector<8x128xf32>
    %c1_28 = arith.constant 1 : index
    %c0_29 = arith.constant 0 : index
    %c0_30 = arith.constant 0 : index
    %39 = vector.load %arg4[%c1_28, %c0_29, %c0_30] : memref<2x16x128xf32, #tpu.memory_space<vmem>>, vector<1x8x128xf32>
    %40 = vector.shape_cast %39 : vector<1x8x128xf32> to vector<8x128xf32>
    %41 = vector.shape_cast %38 : vector<8x128xf32> to vector<1x8x128xf32>
    tpu.vector_store %arg4[%c1_28, %c0_29, %c0_30], %41 {strides = array<i32>} : memref<2x16x128xf32, #tpu.memory_space<vmem>>, vector<1x8x128xf32>,
    %42 = vector.extract_strided_slice %29 {offsets = [0, 128], sizes = [8, 128], strides = [1, 1]} : vector<16x256xf32> to vector<8x128xf32>
    %43 = vector.extract_strided_slice %29 {offsets = [8, 0], sizes = [8, 128], strides = [1, 1]} : vector<16x256xf32> to vector<8x128xf32>
    %44 = arith.addf %42, %43 : vector<8x128xf32>
    %45 = vector.broadcast %33 : vector<1x128xf32> to vector<8x128xf32>
    %46 = arith.addf %44, %45 : vector<8x128xf32>
    %c1_31 = arith.constant 1 : index
    %c8_32 = arith.constant 8 : index
    %c0_33 = arith.constant 0 : index
    %47 = vector.load %arg4[%c1_31, %c8_32, %c0_33] : memref<2x16x128xf32, #tpu.memory_space<vmem>>, vector<1x8x128xf32>
    %48 = vector.shape_cast %47 : vector<1x8x128xf32> to vector<8x128xf32>
    %49 = vector.shape_cast %46 : vector<8x128xf32> to vector<1x8x128xf32>
    tpu.vector_store %arg4[%c1_31, %c8_32, %c0_33], %49 {strides = array<i32>} : memref<2x16x128xf32, #tpu.memory_space<vmem>>, vector<1x8x128xf32>,
    return
  }
  func.func @transform_0(%arg0: i32) -> (i32, i32, i32) {
    %c0_i32 = arith.constant 0 : i32
    %c0_i32_0 = arith.constant 0 : i32
    %c0_i32_1 = arith.constant 0 : i32
    return %arg0, %c0_i32, %c0_i32_0 : i32, i32, i32
  }
  func.func @transform_1(%arg0: i32) -> (i32, i32, i32) {
    %c0_i32 = arith.constant 0 : i32
    %c0_i32_0 = arith.constant 0 : i32
    %c0_i32_1 = arith.constant 0 : i32
    return %arg0, %c0_i32, %c0_i32_0 : i32, i32, i32
  }
  func.func @transform_2(%arg0: i32) -> (i32, i32, i32) {
    %c0_i32 = arith.constant 0 : i32
    %c0_i32_0 = arith.constant 0 : i32
    %c0_i32_1 = arith.constant 0 : i32
    return %arg0, %c0_i32, %c0_i32_0 : i32, i32, i32
  }
  func.func @transform_3(%arg0: i32) -> (i32, i32, i32) {
    %c0_i32 = arith.constant 0 : i32
    %c0_i32_0 = arith.constant 0 : i32
    %c0_i32_1 = arith.constant 0 : i32
    return %arg0, %c0_i32, %c0_i32_0 : i32, i32, i32
  }
}

</mosaic_0001>

<bundles_post_ra>
// kernel: custom-call.1
= control target key start
LH: loop header
LB: loop body
LE: loop exit
PB: predicated region body
PF: predicated region fallthrough
CT: control target
= control target key end

     0   :  { %s22_s0 = inlined_call_operand.vmem [shape: c64[2,4,16], index: 0, kind: input, shape index: {}]   ;;  %s23_s1 = inlined_call_operand.vmem [shape: f32[2,4,16], index: 1, kind: output, shape index: {}]  }
   0x1   :  { %v5_v0 = vld [vmem:[%s22_s0 + $0x8] sm:$0xff] }
   0x2   :  { %4 = vst [vmem:[%s23_s1] sm:$0xff] %v5_v0 }

// kernel: custom-call
= control target key start
LH: loop header
LB: loop body
LE: loop exit
PB: predicated region body
PF: predicated region fallthrough
CT: control target
= control target key end

     0   :  { %s20_s0 = inlined_call_operand.vmem [shape: c64[2,4,16], index: 0, kind: input, shape index: {}]   ;;  %s21_s1 = inlined_call_operand.vmem [shape: f32[2,4,16], index: 1, kind: output, shape index: {}]  }
   0x1   :  { %v2_v0 = vld [vmem:[%s20_s0] sm:$0xff] }
   0x2   :  { %3 = vst [vmem:[%s21_s1] sm:$0xff] %v2_v0 }

// kernel: custom-call.2
= control target key start
LH: loop header
LB: loop body
LE: loop exit
PB: predicated region body
PF: predicated region fallthrough
CT: control target
= control target key end

     0   :  { %s37_s0 = inlined_call_operand.vmem [shape: f32[2,4,16], index: 0, kind: input, shape index: {}]   ;;  %s38_s1 = inlined_call_operand.vmem [shape: f32[2,4,16], index: 1, kind: input, shape index: {}]   ;;  %s39_s2 = inlined_call_operand.vmem [shape: c64[2,4,16], index: 2, kind: output, shape index: {}]  }
   0x1   :  { %v5_v0 = vld [vmem:[%s37_s0] sm:$0xff] }
   0x2   :  { %v7_v1 = vld [vmem:[%s38_s1] sm:$0xff]  ;;  %6 = vst [vmem:[%s39_s2] sm:$0xff] %v5_v0 }
   0x3   :  { %9 = vst [vmem:[%s39_s2 + $0x8] sm:$0xff] %v7_v1 }

// kernel: spectral_mixer_1d_forward.1
= control target key start
LH: loop header
LB: loop body
LE: loop exit
PB: predicated region body
PF: predicated region fallthrough
CT: control target
= control target key end

     0   :  { %8 = vsyncpa [#allocation3], 0  ;;  %s862_s0 = inlined_call_operand.vmem [shape: f32[4,16,16], index: 0, kind: input, shape index: {}]   ;;  %s863_s1 = inlined_call_operand.vmem [shape: f32[4,16,256], index: 1, kind: input, shape index: {}]   ;;  %s864_s2 = inlined_call_operand.hbm [shape: f32[4,8,128], index: 2, kind: input, shape index: {}]   ;;  %s865_s3 = inlined_call_operand.vmem [shape: f32[4,16,128], index: 3, kind: output, shape index: {}]  }
   0x1   :  { %10 = vsyncpa [#allocation3 + $0x1], 0  ;;  %s735_s12 = smov 0   ;;  %s737_s13 = smov 0  }
   0x2   :  { %s739_s14 = smov 0   ;;  %s741_s15 = smov 0  }
   0x3 LB: > { %s553_s16 = sadd.s32 4294967295, %s709_s15   ;;  %s755_s17 = sadd.s32 1, %s709_s15   ;;  %s709_s15 = sphi %s741_s15, %s872_s15   ;;  %s705_s14 = sphi %s739_s14, %s871_s14   ;;  %s701_s13 = sphi %s737_s13, %s870_s13   ;;  %s697_s12 = sphi %s735_s12, %s869_s12  }
   0x4   : > { %s72_s18 = ssub.s32 %s709_s15, %s755_s17  ;;  %s75_s19 = sadd.s32 1, %s705_s14 }
   0x5   : > { %p73_p0 = scmp.eq.s32.totalorder %s72_s18, 0  ;;  %p82_p1 = scmp.ne.s32.totalorder %s705_s14, %s701_s13 }
   0x6   : > { %p83_p2 = scmp.eq.s32.totalorder %s709_s15, 0  ;;  %p88_p3 = scmp.ne.s32.totalorder %s701_s13, %s697_s12 }
   0x7   : > { %s765_s20 = scalar_select %p73_p0, %s705_s14, %s75_s19  }
   0x8   : > { %p84_p4 = por %p83_p2, %p82_p1  ;;  %p89_p5 = scmp.eq.s32.totalorder %s553_s16, 0 }
   0x9   : > { %p609_p6 = scmp.lt.s32.totalorder %s709_s15, 2  ;;  %s158_s22 = sand.u32 1, %s705_s14  }
   0xa   : > { %p770_p7 = por %p89_p5, %p88_p3  ;;  %s557_s23 = sshll.u32 %s158_s22, 4 }
   0xb   : > { %s591_s24 = sshll.u32 %s709_s15, 8  ;;  %s162_s28 = scalar_lea.vmem [#allocation2], %s557_s23 }
   0xc   : > { %s779_s27 = scalar_lea.hbm %s864_s2, %s591_s24  ;;  %s169_s29 = sshll.u32 %s162_s28, 4  ;;  %s781_s29 = int_to_ptr.vmem [resolvable:$true] %s169_s29 }
   0xd   : > { %p783_p8 = pnand %p609_p6, %p84_p4  ;;  %s788_s4 = scalar_lea.sflag [#allocation3], %s158_s22 }
   0xe   : > { %s645_s5 = scalar_lea.hbm %s779_s27, 256  ;;  %s650_s8 = scalar_lea.hbm %s864_s2, 512 }
   0xf   : > { %p646_p10 = scmp.ne.s32.totalorder %s779_s27, %s645_s5  ;;  %p647_p11 = pneg %p783_p8 }
  0x10   : > { %p651_p0 = scmp.lt.u32.totalorder %s779_s27, %s864_s2  ;;  %p652_p1 = scmp.lt.u32.totalorder %s650_s8, %s645_s5 }
  0x11   : > { %p648_p12 = pnand %p647_p11, %p646_p10  ;;  %p654_p3 = scmp.lt.u32.totalorder %s645_s5, %s779_s27 }
  0x12   : > { %p653_p2 = por %p652_p1, %p651_p0 }
  0x13   : > { %p649_p13 = pneg %p648_p12 }
  0x14   : > { %p655_p4 = por %p654_p3, %p653_p2 }
  0x16   : > { %p656_p5 = pnand %p655_p4, %p649_p13 }
  0x18   : > { %659 = shalt.err (!%p656_p5)
}
  0x19   : > { %s660_s11 = scalar_lea.vmem %s781_s29, 256  ;;  %s711_s12 = smov [#allocation2]  }
  0x1a   : > { %p661_p6 = scmp.ne.s32.totalorder %s781_s29, %s660_s11  ;;  %s665_s18 = sshll.u32 %s711_s12, 4  ;;  %s666_s18 = int_to_ptr.vmem [resolvable:$false] %s665_s18 }
  0x1b   : > { %s667_s19 = scalar_lea.vmem %s666_s18, 512  ;;  %p668_p9 = scmp.lt.s32.totalorder %s781_s29, %s666_s18 }
  0x1c   : > { %p663_p10 = pnand %p661_p6, %p647_p11  ;;  %p669_p0 = scmp.lt.s32.totalorder %s667_s19, %s660_s11 }
  0x1e   : > { %p664_p12 = pneg %p663_p10  ;;  %p670_p1 = por %p669_p0, %p668_p9 }
  0x20   : > { %p671_p2 = pnand %p670_p1, %p664_p12 }
  0x22   : > { %674 = shalt.err (!%p671_p2)
}
  0x23   : > { %s712_s22 = smov 128   ;;  %s713_s23 = smov 8  }
  0x24   : > { %608 = dma.hbm_to_vmem [thread:$0]  (!%p783_p8), %s779_s27, 256, %s781_s29, %s788_s4, %s712_s22, %s712_s22, %s713_s23  }
  0x25   : > { %p177_p11 = scmp.lt.s32.totalorder %s709_s15, 3  ;;  %p868_p13 = scmp.ge.s32.totalorder %s709_s15, 1 }
  0x27   : > { %p178_p3 = pnand %p868_p13, %p177_p11 }
  0x28   : > { %s183_s24 = sand.u32 (!%p178_p3), 1, %s701_s13  }
  0x29   : > { %181 = sbr.rel (%p178_p3) target bundleno = 285 (0x11d), region = 32  ;;  %s561_s25 = sshll.u32 (!%p178_p3), %s183_s24, 4 }
  0x2a   : > { %s184_s26 = scalar_lea.sflag (!%p178_p3), [#allocation3], %s183_s24  ;;  %s820_s28 = scalar_lea.vmem (!%p178_p3), [#allocation2], %s561_s25 }
  0x30   : > { %692 = dma.done.wait (%p770_p7), %s184_s26, 256  }
  0x31   : > { %694 = vsyncadd (%p770_p7), %s184_s26, 4294967040  ;;  %s562_s30 = sshll.u32 %s553_s16, 1  ;;  %v714_v0 = vmov 0.0   ;;  %vm251_vm0 = vcmask 130048   ;;  %v574_v22 = vld [vmem:[%s820_s28 + $0x1] ss:$0 sm:$0xff] }
  0x32   : > { %p224_p8 = scmp.lt.s32.totalorder %s562_s30, 3  ;;  %322 = vmatprep.mubr.f32.mxu0 %v714_v0  ;;  %429 = vmatprep.mubr.f32.mxu1 %v714_v0  ;;  %v587_v25 = vld [vmem:[%s820_s28 + $0x9] ss:$0 sm:$0xff]  ;;  %v573_v27 = vld [vmem:[%s820_s28] ss:$0 sm:$0xff] }
  0x33   : > { %v585_v31 = vld [vmem:[%s820_s28 + $0x8] ss:$0 sm:$0xff] }
  0x34   : > { %s874_s30 = smov (!%p224_p8, %s562_s30), 3 }
  0x35   : > { %s593_s27 = sshll.u32 %s874_s30, 5  ;;  %s592_s29 = sshll.u32 %s874_s30, 4 }
  0x36   : > { %s235_s6 = scalar_lea.vmem %s863_s1, %s593_s27  ;;  %s228_s21 = scalar_lea.vmem %s862_s0, %s592_s29 }
  0x37   : > { %v248_v1 = vld [vmem:[%s235_s6 + $0x8] sm:$0xff]  ;;  %v250_v2 = vld [vmem:[%s235_s6 + $0x18] sm:$0xff]  ;;  %v247_v6 = vld [vmem:[%s235_s6] sm:$0xff]  ;;  %s243_s9 = scalar_lea.vmem %s865_s3, %s592_s29 }
  0x38   : > { %v578_v3 = vld [vmem:[%s235_s6 + $0x28] sm:$0xff]  ;;  %v595_v4 = vpack.c.bf16 %v250_v2, %v248_v1  ;;  %v580_v5 = vld [vmem:[%s235_s6 + $0x38] sm:$0xff]  ;;  %v249_v7 = vld [vmem:[%s235_s6 + $0x10] sm:$0xff] }
  0x39   : > { %v599_v8 = vpack.c.bf16 %v580_v5, %v578_v3  ;;  %v597_v9 = vpack.c.bf16 %v249_v7, %v247_v6  ;;  %v577_v10 = vld [vmem:[%s235_s6 + $0x20] sm:$0xff]  ;;  %v579_v11 = vld [vmem:[%s235_s6 + $0x30] sm:$0xff]  ;;  %v246_v15 = vld [vmem:[%s228_s21 + $0x8] sm:$0xff] }
  0x3a   : > { %596 = vmatprep.subr.bf16.mxu0 %v595_v4  ;;  %v601_v12 = vpack.c.bf16 %v579_v11, %v577_v10  ;;  %v245_v13 = vld [vmem:[%s228_s21] sm:$0xff]  ;;  %v575_v14 = vld [vmem:[%s228_s21 + $0x10] sm:$0xff]  ;;  %v576_v16 = vld [vmem:[%s228_s21 + $0x18] sm:$0xff] }
  0x3b   : > { %600 = vmatprep.subr.bf16.mxu1 %v599_v8  ;;  %598 = vmatpush1.bf16.msra.mxu0 %v597_v9 }
  0x3c   : > { %602 = vmatpush1.bf16.msra.mxu1 %v601_v12 }
  0x3e   : > { %571 = vmatmul.mubr.msk.f32.vlgmr.msra.gmra.mrb[0].mxu0 %vm251_vm0, %v245_v13 }
  0x3f   : > { %581 = vmatmul.mubr.msk.f32.vlgmr.msra.gmra.mrb[0].mxu1 %vm251_vm0, %v575_v14  ;;  %328 = vmatprep.mubr.f32.mxu0 %v714_v0 }
  0x40   : > { %435 = vmatprep.mubr.f32.mxu1 %v714_v0 }
  0x42   : > { %572 = vmatmul.mubr.msk.f32.gmra.mrb[2].mxu0 %vm251_vm0, %v246_v15 }
  0x43   : > { %582 = vmatmul.mubr.msk.f32.gmra.mrb[2].mxu1 %vm251_vm0, %v576_v16 }
 0x111   : > { %v324_v17 = vpop.f32.mrb[0].mxu0 }
 0x112   : > { %v431_v18 = vpop.f32.mrb[0].mxu1  ;;  %v326_v19 = vpop.f32.mrb[1].mxu0 }
 0x113   : > { %v433_v20 = vpop.f32.mrb[1].mxu1 }
 0x115   : > { %v330_v21 = vpop.f32.mrb[2].mxu0 }
 0x116   : > { %v344_v23 = vadd.f32 %v330_v21, %v326_v19  ;;  %v437_v24 = vpop.f32.mrb[2].mxu1  ;;  %v332_v26 = vpop.f32.mrb[3].mxu0 }
 0x117   : > { %v453_v28 = vadd.f32 %v437_v24, %v433_v20  ;;  %v337_v29 = vsub.f32 %v324_v17, %v332_v26  ;;  %v439_v30 = vpop.f32.mrb[3].mxu1 }
 0x118   : > { %v349_v32 = vadd.f32 %v574_v22, %v344_v23  ;;  %v445_v33 = vsub.f32 %v431_v18, %v439_v30 }
 0x119   : > { %v458_v34 = vadd.f32 %v587_v25, %v453_v28  ;;  %v342_v35 = vadd.f32 %v573_v27, %v337_v29 }
 0x11a   : > { %350 = vst [vmem:[%s243_s9 + $0x8] sm:$0xff] %v349_v32  ;;  %v450_v36 = vadd.f32 %v585_v31, %v445_v33 }
 0x11b   : > { %588 = vst [vmem:[%s243_s9 + $0x18] sm:$0xff] %v458_v34  ;;  %343 = vst [vmem:[%s243_s9] sm:$0xff] %v342_v35 }
 0x11c   : > { %586 = vst [vmem:[%s243_s9 + $0x10] sm:$0xff] %v450_v36 }
 0x11d PF: > { %p13_p7 = scmp.ge.s32.totalorder %s755_s17, 4   ;;  %s869_s12 = smov %s701_s13 }
 0x11e   : > { %s870_s13 = smov %s705_s14  ;;  %s871_s14 = smov %s765_s20 }
 0x11f   : > { %s872_s15 = smov %s755_s17  ;;  %15 = sbr.rel (!%p13_p7) target bundleno = 3 (0x3), region = 82 }
 0x126   :  { %484 = vsyncpa [#allocation3], 1 }
 0x127   :  { %486 = vsyncpa [#allocation3 + $0x1], 1 }

</bundles_post_ra>
